<compile_context>
chip_gen: v7x
topology: tpu7x:2x2x1
jax: 0.10.0
libtpu: 0.0.40
codegen_flags: <defaults>
</compile_context>

<pallas_src>
import functools

import numpy as np
import jax
import jax.numpy as jnp
from jax.experimental import pallas as pl
from jax.experimental.pallas import tpu as pltpu


def _hadamard(n):
    """Sylvester Hadamard matrix, n must be a power of 2."""
    H = np.array([[1.0]], dtype=np.float64)
    while H.shape[0] < n:
        H = np.block([[H, H], [H, -H]])
    return H


def get_hash_targets(n_class, bit):
    H_K = _hadamard(bit)
    H_2K = np.concatenate((H_K, -H_K), 0)
    assert H_2K.shape[0] >= n_class, "small-shape demo assumes 2*bit >= n_class"
    return jnp.asarray(H_2K[:n_class], dtype=jnp.float32)


def _csq_kernel(u_ref, y_ref, ht_ref, out_ref, *, lam, tile_rows, lane_w,
                valid_elems, need_mask):
    # u_ref:  (tile_rows, lane_w)      lane-dense view of pre-tanh codes
    # y_ref:  (tile_rows, R*n_class)   lane-dense view of one-hot labels
    # ht_ref: (R*n_class, lane_w)      block-diag replicated hash targets (+-1), bf16
    u = jnp.tanh(u_ref[...].astype(jnp.float32))

    # label2center: for one-hot y, argmax-gather == y @ hash_targets (exact).
    center = jnp.dot(y_ref[...].astype(jnp.bfloat16), ht_ref[...],
                     preferred_element_type=jnp.float32)

    # BCE with targets in {0,1} exactly (centers are +-1):
    #   bce = -max(log(0.5*(1 + center*u)), -100)    (torch-style log clamp)
    bce = -jnp.maximum(jnp.log(0.5 * (1.0 + center * u)), -100.0)
    quant = (jnp.abs(u) - 1.0) ** 2
    contrib = bce + jnp.float32(lam) * quant

    if need_mask:  # only emitted when the wrapper had to pad the batch
        row = jax.lax.broadcasted_iota(jnp.int32, contrib.shape, 0)
        col = jax.lax.broadcasted_iota(jnp.int32, contrib.shape, 1)
        gidx = (pl.program_id(0) * tile_rows + row) * lane_w + col
        contrib = jnp.where(gidx < valid_elems, contrib, 0.0)

    # Single fused reduction; per-block partial sum replicated across the
    # 128-lane output block (full-width, unmasked vector store).
    partial = jnp.sum(contrib)
    out_ref[...] = jnp.broadcast_to(partial, out_ref.shape).astype(jnp.float32)


def csq_loss(u, y, hash_targets, lam, *, tile_rows=512):
    B, bit = u.shape
    n_class = y.shape[1]
    assert hash_targets.shape == (n_class, bit)
    assert bit & (bit - 1) == 0, "Hadamard hash targets require power-of-two bit"

    # Lane-dense packing: R consecutive batch rows per 128-lane view row.
    r = max(1, 128 // bit)
    lane_w = r * bit

    rows = pl.cdiv(B, r)
    tile_rows = min(tile_rows, rows)
    rows_pad = pl.cdiv(rows, tile_rows) * tile_rows
    b_pad = rows_pad * r
    nblk = rows_pad // tile_rows

    if b_pad != B:
        u = jnp.pad(u, ((0, b_pad - B), (0, 0)))
        y = jnp.pad(y, ((0, b_pad - B), (0, 0)))
    u_view = u.reshape(rows_pad, lane_w)          # free row-major reshape
    y_view = y.reshape(rows_pad, r * n_class)     # free row-major reshape

    # Block-diagonal replication of hash_targets so the gather matmul emits
    # centers directly in the lane-dense layout.  bf16 is exact for 0/1, +-1.
    ht_bf16 = hash_targets.astype(jnp.bfloat16)
    ht_big = jnp.zeros((r * n_class, lane_w), jnp.bfloat16)
    for k in range(r):
        ht_big = ht_big.at[k * n_class:(k + 1) * n_class,
                           k * bit:(k + 1) * bit].set(ht_bf16)

    kernel = functools.partial(
        _csq_kernel, lam=float(lam), tile_rows=tile_rows, lane_w=lane_w,
        valid_elems=B * bit, need_mask=(b_pad != B))

    partials = pl.pallas_call(
        kernel,
        out_shape=jax.ShapeDtypeStruct((1, nblk * 128), jnp.float32),
        grid=(nblk,),
        in_specs=[
            pl.BlockSpec((tile_rows, lane_w), lambda i: (i, 0)),
            pl.BlockSpec((tile_rows, r * n_class), lambda i: (i, 0)),
            pl.BlockSpec((r * n_class, lane_w), lambda i: (0, 0)),  # resident
        ],
        out_specs=pl.BlockSpec((1, 128), lambda i: (0, i)),
        compiler_params=pltpu.CompilerParams(
            dimension_semantics=("parallel",),
            vmem_limit_bytes=32 * 1024 * 1024),
    )(u_view, y_view, ht_big)

    # Per-block partials (value replicated across 128 lanes) -> scalar loss.
    total = jnp.sum(partials.reshape(nblk, 128)[:, 0])
    return total / jnp.float32(B * bit)


def csq_loss_ref(u, y, hash_targets, lam):
    """Pure-JAX reference in the original torch form (argmax gather, two
    clamped logs, two separate means)."""
    u = jnp.tanh(u.astype(jnp.float32))
    center = hash_targets[jnp.argmax(y, axis=1)]
    p = 0.5 * (u + 1.0)
    t = 0.5 * (center + 1.0)
    bce = -(t * jnp.maximum(jnp.log(p), -100.0)
            + (1.0 - t) * jnp.maximum(jnp.log(1.0 - p), -100.0))
    center_loss = jnp.mean(bce)
    q_loss = jnp.mean((jnp.abs(u) - 1.0) ** 2)
    return center_loss + lam * q_loss


if __name__ == "__main__":
    # Small, deterministic shapes consistent with CSQLoss usage.
    batch, bit, n_class = 8, 32, 4
    config = {"dataset": "cifar10", "n_class": n_class, "lambda": 1e-4}

    key = jax.random.PRNGKey(0)
    k_u, k_lbl, k_rc = jax.random.split(key, 3)

    u = jax.random.normal(k_u, (batch, bit), dtype=jnp.float32)
    labels = jax.random.randint(k_lbl, (batch,), 0, n_class)
    y = jax.nn.one_hot(labels, n_class, dtype=jnp.float32)

    hash_targets = get_hash_targets(n_class, bit)
    # multi_label_random_center (unused in single-label path, kept for parity)
    _multi_label_random_center = jax.random.randint(
        k_rc, (bit,), 0, 2).astype(jnp.float32)

    loss = csq_loss(u, y, hash_targets, config["lambda"])
    jax.block_until_ready(loss)

    ref = csq_loss_ref(u, y, hash_targets, config["lambda"])
    np.testing.assert_allclose(np.asarray(loss), np.asarray(ref),
                               rtol=2e-5, atol=2e-5)
    print("KERNEL_OK")
</pallas_src>

<mosaic_0001>
module attributes {stable_mosaic.version = 11 : i64} {
  func.func @_csq_kernel(%arg0: i32, %arg1: memref<2x128xf32, #tpu.memory_space<vmem>>, %arg2: memref<2x16xf32, #tpu.memory_space<vmem>>, %arg3: memref<16x128xbf16, #tpu.memory_space<vmem>>, %arg4: memref<1x128xf32, #tpu.memory_space<vmem>>) attributes {dimension_semantics = [#tpu.dimension_semantics<parallel>], iteration_bounds = array<i64: 1>, scalar_prefetch = 0 : i64, scratch_operands = 0 : i64, tpu.core_type = #tpu.core_type<tc>, window_params = [{transform_indices = @transform_0, window_bounds = array<i64: 2, 128>}, {transform_indices = @transform_1, window_bounds = array<i64: 2, 16>}, {pipeline_mode = #tpu.pipeline_mode<synchronous>, transform_indices = @transform_2, window_bounds = array<i64: 16, 128>}, {transform_indices = @transform_3, window_bounds = array<i64: 1, 128>}]} {
    %c0 = arith.constant 0 : index
    %c0_0 = arith.constant 0 : index
    %0 = vector.load %arg1[%c0, %c0_0] : memref<2x128xf32, #tpu.memory_space<vmem>>, vector<2x128xf32>
    %1 = math.tanh %0 : vector<2x128xf32>
    %c0_1 = arith.constant 0 : index
    %c0_2 = arith.constant 0 : index
    %2 = vector.load %arg2[%c0_1, %c0_2] : memref<2x16xf32, #tpu.memory_space<vmem>>, vector<2x16xf32>
    %3 = arith.truncf %2 : vector<2x16xf32> to vector<2x16xbf16>
    %c0_3 = arith.constant 0 : index
    %c0_4 = arith.constant 0 : index
    %4 = vector.load %arg3[%c0_3, %c0_4] : memref<16x128xbf16, #tpu.memory_space<vmem>>, vector<16x128xbf16>
    %cst = arith.constant dense<0.000000e+00> : vector<2x128xf32>
    %5 = tpu.matmul %3, %4, %cst {dimension_numbers = #tpu.dot_dimension_numbers<[1], [0], [0], [1], [0, 0, 1, 1], [], []>} : vector<2x16xbf16>, vector<16x128xbf16>, vector<2x128xf32> -> vector<2x128xf32>
    %6 = arith.mulf %5, %1 : vector<2x128xf32>
    %cst_5 = arith.constant 1.000000e+00 : f32
    %7 = vector.broadcast %cst_5 : f32 to vector<2x128xf32>
    %8 = arith.addf %7, %6 : vector<2x128xf32>
    %cst_6 = arith.constant 5.000000e-01 : f32
    %9 = vector.broadcast %cst_6 : f32 to vector<2x128xf32>
    %10 = arith.mulf %9, %8 : vector<2x128xf32>
    %11 = math.log %10 : vector<2x128xf32>
    %cst_7 = arith.constant -1.000000e+02 : f32
    %12 = vector.broadcast %cst_7 : f32 to vector<2x128xf32>
    %13 = arith.maximumf %11, %12 : vector<2x128xf32>
    %cst_8 = arith.constant 0.000000e+00 : f32
    %14 = vector.broadcast %cst_8 : f32 to vector<2x128xf32>
    %15 = arith.subf %14, %13 : vector<2x128xf32>
    %16 = math.absf %1 : vector<2x128xf32>
    %cst_9 = arith.constant 1.000000e+00 : f32
    %17 = vector.broadcast %cst_9 : f32 to vector<2x128xf32>
    %18 = arith.subf %16, %17 : vector<2x128xf32>
    %19 = arith.mulf %18, %18 : vector<2x128xf32>
    %cst_10 = arith.constant 9.99999974E-5 : f32
    %20 = vector.broadcast %cst_10 : f32 to vector<2x128xf32>
    %21 = arith.mulf %20, %19 : vector<2x128xf32>
    %22 = arith.addf %15, %21 : vector<2x128xf32>
    %23 = vector.shape_cast %22 : vector<2x128xf32> to vector<1x2x128xf32>
    %cst_11 = arith.constant dense<0.000000e+00> : vector<1xf32>
    %24 = vector.multi_reduction <add>, %23, %cst_11 [1, 2] : vector<1x2x128xf32> to vector<1xf32>
    %25 = vector.shape_cast %24 : vector<1xf32> to vector<1x1x1xf32>
    %26 = vector.extract %25[0, 0, 0] : f32 from vector<1x1x1xf32>
    %27 = vector.broadcast %26 : f32 to vector<1x128xf32>
    %c0_12 = arith.constant 0 : index
    %c0_13 = arith.constant 0 : index
    %28 = vector.load %arg4[%c0_12, %c0_13] : memref<1x128xf32, #tpu.memory_space<vmem>>, vector<1x128xf32>
    tpu.vector_store %arg4[%c0_12, %c0_13], %27 {strides = array<i32>} : memref<1x128xf32, #tpu.memory_space<vmem>>, vector<1x128xf32>,
    return
  }
  func.func @transform_0(%arg0: i32) -> (i32, i32) {
    %c0_i32 = arith.constant 0 : i32
    %c0_i32_0 = arith.constant 0 : i32
    return %arg0, %c0_i32 : i32, i32
  }
  func.func @transform_1(%arg0: i32) -> (i32, i32) {
    %c0_i32 = arith.constant 0 : i32
    %c0_i32_0 = arith.constant 0 : i32
    return %arg0, %c0_i32 : i32, i32
  }
  func.func @transform_2(%arg0: i32) -> (i32, i32) {
    %c0_i32 = arith.constant 0 : i32
    %c0_i32_0 = arith.constant 0 : i32
    %c0_i32_1 = arith.constant 0 : i32
    return %c0_i32, %c0_i32_0 : i32, i32
  }
  func.func @transform_3(%arg0: i32) -> (i32, i32) {
    %c0_i32 = arith.constant 0 : i32
    %c0_i32_0 = arith.constant 0 : i32
    return %c0_i32, %arg0 : i32, i32
  }
}

</mosaic_0001>

<bundles_post_ra>
// kernel: tpu_custom_call.1
= control target key start
LH: loop header
LB: loop body
LE: loop exit
PB: predicated region body
PF: predicated region fallthrough
CT: control target
= control target key end

     0   :  { %8 = vsyncpa [#allocation3], 0  ;;  %s309_s0 = inlined_call_operand.hbm [shape: f32[2,128], index: 0, kind: input, shape index: {}]   ;;  %s310_s1 = inlined_call_operand.vmem [shape: f32[2,16], index: 1, kind: input, shape index: {}]   ;;  %s311_s2 = inlined_call_operand.hbm [shape: bf16[16,128], index: 2, kind: input, shape index: {}]   ;;  %s312_s3 = inlined_call_operand.hbm [shape: f32[1,128], index: 3, kind: output, shape index: {}]  }
   0x1   :  { %9 = vsyncpa [#allocation6], 0 }
   0x2   :  { %10 = vsyncpa [#allocation4], 0  ;;  %s236_s12 = smov [#allocation2]   ;;  %s237_s14 = smov [#allocation5]  }
   0x3   :  { %s17_s13 = sshll.u32 %s236_s12, 4  ;;  %s28_s15 = sshll.u32 %s237_s14, 4  ;;  %s18_s13 = int_to_ptr.vmem [resolvable:$true] %s17_s13  ;;  %s263_s15 = int_to_ptr.vmem [resolvable:$true] %s28_s15 }
   0x4   :  { %s164_s18 = scalar_lea.hbm %s309_s0, 32 }
   0x5   :  { %p165_p0 = scmp.ne.s32.totalorder %s309_s0, %s164_s18  ;;  %p168_p1 = scmp.lt.u32.totalorder %s164_s18, %s309_s0 }
   0x7   :  { %p170_p2 = pnand %p168_p1, %p165_p0 }
   0x9   :  { %173 = shalt.err (!%p170_p2)
}
   0xa   :  { %s174_s23 = scalar_lea.vmem %s18_s13, 32  ;;  %p179_p4 = scmp.lt.s32.totalorder %s18_s13, %s18_s13 }
   0xb   :  { %p175_p3 = scmp.ne.s32.totalorder %s18_s13, %s174_s23  ;;  %p180_p5 = scmp.lt.s32.totalorder %s174_s23, %s174_s23 }
   0xd   :  { %p181_p6 = por %p180_p5, %p179_p4 }
   0xf   :  { %p182_p7 = pnand %p181_p6, %p175_p3 }
  0x11   :  { %185 = shalt.err (!%p182_p7)
}
  0x12   :  { %20 = dma.hbm_to_vmem [thread:$0]  %s309_s0, 32, %s18_s13, [#allocation3]  }
  0x13   :  { %s186_s28 = scalar_lea.hbm %s311_s2, 128 }
  0x14   :  { %p187_p8 = scmp.ne.s32.totalorder %s311_s2, %s186_s28  ;;  %p190_p9 = scmp.lt.u32.totalorder %s186_s28, %s311_s2 }
  0x16   :  { %p192_p10 = pnand %p190_p9, %p187_p8 }
  0x18   :  { %195 = shalt.err (!%p192_p10)
}
  0x19   :  { %s196_s6 = scalar_lea.vmem %s263_s15, 128  ;;  %p201_p12 = scmp.lt.s32.totalorder %s263_s15, %s263_s15 }
  0x1a   :  { %p197_p11 = scmp.ne.s32.totalorder %s263_s15, %s196_s6  ;;  %p202_p13 = scmp.lt.s32.totalorder %s196_s6, %s196_s6 }
  0x1c   :  { %p203_p0 = por %p202_p13, %p201_p12 }
  0x1e   :  { %p204_p1 = pnand %p203_p0, %p197_p11 }
  0x20   :  { %207 = shalt.err (!%p204_p1)
}
  0x21   :  { %s238_s0 = smov 64   ;;  %s239_s7 = smov 4  }
  0x22   :  { %34 = dma.hbm_to_vmem [thread:$0]  %s311_s2, 128, %s263_s15, [#allocation6], %s238_s0, %s238_s0, %s239_s7  }
  0x23   :  { %230 = dma.done.wait [#allocation3], 32  }
  0x24   :  { %231 = vsyncadd [#allocation3], 4294967264 }
  0x25   :  { %232 = dma.done.wait [#allocation6], 128  }
  0x26   :  { %233 = vsyncadd [#allocation6], 4294967168  ;;  %v240_v0 = vmov 0.0   ;;  %vm241_vm0 = vmmov 0   ;;  %v159_v1 = vld [vmem:[#allocation5] sm:$0xff]   ;;  %vm54_vm1 = vcmask 130048  }
  0x27   :  { %144 = vmatprep.subr.bf16.mxu0 %v240_v0  ;;  %146 = vmatprep.mubr.msk.bf16.mxu0 %vm241_vm0, %v240_v0  ;;  %v44_v2 = vld [vmem:[%s310_s1] sm:$0x3]  ;;  %vm110_vm2 = vcmask 1041408   ;;  %s242_s1 = smov [#allocation7]  }
  0x28   :  { %145 = vmatpush3.bf16.msra.mxu0 %v159_v1  ;;  %v45_v3 = vpack.c.bf16 %v44_v2, %v44_v2  ;;  %v42_v4 = vld [vmem:[#allocation2] sm:$0x3]  ;;  %s129_s2 = sshll.u32 %s242_s1, 4  ;;  %s130_s2 = int_to_ptr.vmem [resolvable:$true] %s129_s2 }
  0x29   :  { %160 = vtanh.f32 %v42_v4  ;;  %s208_s13 = scalar_lea.vmem %s130_s2, 16  ;;  %s212_s14 = scalar_lea.vmem %s130_s2, 32 }
  0x2a   :  { %p209_p2 = scmp.ne.s32.totalorder %s130_s2, %s208_s13  ;;  %p213_p3 = scmp.lt.s32.totalorder %s130_s2, %s130_s2 }
  0x2b   :  { %147 = vmatmul.mubr.msk.bf16.vlgmr.msra.gmra.mrb[0].mxu0 %vm54_vm1, %v45_v3  ;;  %p214_p4 = scmp.lt.s32.totalorder %s212_s14, %s208_s13 }
  0x2d   :  { %p215_p5 = por %p214_p4, %p213_p3 }
  0x2f   :  { %p216_p6 = pnand %p215_p5, %p209_p2 }
  0x33   :  { %v161_v5 = vpop.eup %160 }
  0x34   :  { %v105_v13 = vand.u32 2147483647, %v161_v5 }
  0x36   :  { %v141_v14 = vadd.f32 -1.0, %v105_v13 }
  0x38   :  { %v107_v15 = vmul.f32 %v141_v14, %v141_v14 }
  0x3a   :  { %v108_v19 = vmul.f32 0.0001, %v107_v15 }
  0xfe   :  { %v92_v6 = vpop.f32.mrb[0].mxu0 }
  0xff   :  { %v98_v7 = vmul.f32 %v161_v5, %v92_v6  ;;  %v148_v8 = vpop.f32.mrb[1].mxu0 }
 0x100   :  { %v95_v9 = vpop.f32.mrb[2].mxu0 }
 0x101   :  { %v99_v10 = vadd.f32 1.0, %v98_v7  ;;  %v149_v11 = vpop.f32.mrb[3].mxu0 }
 0x103   :  { %v100_v12 = vmul.f32 0.5, %v99_v10 }
 0x105   :  { %162 = vlog2.f32 %v100_v12 }
 0x10f   :  { %v163_v16 = vpop.eup %162 }
 0x110   :  { %v102_v17 = vmul.f32 0.6931472, %v163_v16 }
 0x112   :  { %v103_v18 = vmax.f32 %v102_v17, -100.0 }
 0x114   :  { %v104_v20 = vsub.f32 0.0, %v103_v18 }
 0x116   :  { %v109_v21 = vadd.f32 %v108_v19, %v104_v20 }
 0x118   :  { %v111_v22 = vsel %vm110_vm2, %v109_v21, 0.0 }
 0x119   :  { %112 = vadd.xlane.f32.xlu0 %v111_v22 }
 0x1a6   :  { %v113_v23 = vpop.xlane.xlu0 %112 }
 0x1a7   :  { %v114_v24 = vrot.slane %v113_v23, 4 }
 0x1a9   :  { %v115_v25 = vadd.f32 %v114_v24, %v113_v23 }
 0x1ab   :  { %v116_v26 = vrot.slane %v115_v25, 2 }
 0x1ad   :  { %v117_v27 = vadd.f32 %v116_v26, %v115_v25 }
 0x1af   :  { %v118_v28 = vrot.slane %v117_v27, 1 }
 0x1b1   :  { %v119_v29 = vadd.f32 %v118_v28, %v117_v27 }
 0x1b3   :  { %150 = vpush %v119_v29 }
 0x1e4   :  { %s151_s12 = spop %150 }
 0x1e5   :  { %v121_v30 = vstv %s151_s12 }
 0x1e6   :  { %122 = vst [vmem:[#allocation7] sm:$0x1] %v121_v30 }
 0x1e7   :  { %219 = shalt.err (!%p216_p6)
}
 0x1e8   :  { %s220_s17 = scalar_lea.hbm %s312_s3, 16 }
 0x1e9   :  { %p221_p7 = scmp.ne.s32.totalorder %s312_s3, %s220_s17  ;;  %p224_p8 = scmp.lt.u32.totalorder %s220_s17, %s312_s3 }
 0x1eb   :  { %p226_p9 = pnand %p224_p8, %p221_p7 }
 0x1ed   :  { %229 = shalt.err (!%p226_p9)
}
 0x1ee   :  { %132 = dma.vmem_to_hbm [thread:$0]  %s130_s2, 16, %s312_s3, [#allocation4]  }
 0x1ef   :  { %234 = dma.done.wait [#allocation4], 16  }
 0x1f0   :  { %235 = vsyncadd [#allocation4], 4294967280 }
 0x1f1   :  { %136 = vsyncpa [#allocation3], 1 }
 0x1f2   :  { %137 = vsyncpa [#allocation6], 1 }
 0x1f3   :  { %138 = vsyncpa [#allocation4], 1 }

</bundles_post_ra>
